<compile_context>
chip_gen: v7x
topology: tpu7x:2x2x1
jax: 0.10.0
libtpu: 0.0.40
codegen_flags: <defaults>
</compile_context>

<pallas_src>
import jax
import jax.numpy as jnp
from jax import lax
from jax.experimental import pallas as pl
from jax.experimental.pallas import tpu as pltpu


def _fused_gru_kernel(tok_ref,     # SMEM (seq_len,) int32  -- scalar prefetch
                      emb_ref,     # VMEM (V, H)     embedding table (resident)
                      h0_ref,      # VMEM (1, H)     initial hidden
                      wih_ref,     # VMEM (H, 3H)    W_ih^T, gate cols [r|z|n]
                      whh_ref,     # VMEM (H, 3H)    W_hh^T, gate cols [r|z|n]
                      bih_ref,     # VMEM (1, 3H)
                      bhh_ref,     # VMEM (1, 3H)
                      out_ref,     # VMEM (seq_len, H)  all per-step outputs
                      x_scratch,   # VMEM (seq_len, H)  gathered embeddings
                      gi_scratch): # VMEM (seq_len, 3H) precomputed input gates
    seq_len, H = out_ref.shape

    # ---- x-path (no recurrence): gather rows, then ONE batched matmul -------
    def gather_body(t, carry):
        tok = tok_ref[t]
        x_scratch[pl.ds(t, 1), :] = emb_ref[pl.ds(tok, 1), :].astype(jnp.float32)
        return carry

    lax.fori_loop(0, seq_len, gather_body, 0, unroll=True)

    gi_scratch[...] = (
        jnp.dot(x_scratch[...], wih_ref[...], preferred_element_type=jnp.float32)
        + bih_ref[...])

    # ---- serial recurrence: only h @ W_hh^T + elementwise gates per step ----
    whh = whh_ref[...]          # hoisted out of the loop (stay in vregs)
    bhh = bhh_ref[...]

    def step(t, h):             # h: (1, H) f32 carry
        gi = gi_scratch[pl.ds(t, 1), :]                                   # (1, 3H)
        gh = jnp.dot(h, whh, preferred_element_type=jnp.float32) + bhh    # (1, 3H)
        r = jax.nn.sigmoid(gi[:, :H] + gh[:, :H])
        z = jax.nn.sigmoid(gi[:, H:2 * H] + gh[:, H:2 * H])
        n = jnp.tanh(gi[:, 2 * H:] + r * gh[:, 2 * H:])
        h_new = (1.0 - z) * n + z * h                                     # (1, H)
        out_ref[pl.ds(t, 1), :] = h_new.astype(out_ref.dtype)
        return h_new

    h0 = h0_ref[...].astype(jnp.float32)
    lax.fori_loop(0, seq_len, step, h0, unroll=True)


def prepare_params(embedding, w_ih, w_hh, b_ih, b_hh):
    """One-time parameter packing, hoisted out of the per-call path.

    embedding: (V, H);  w_ih/w_hh: (3H, H) PyTorch layout (rows [r|z|n]);
    b_ih/b_hh: (3H,).
    """
    H = embedding.shape[1]
    wih_t = jnp.transpose(w_ih)            # (H, 3H), cols ordered [r|z|n]
    whh_t = jnp.transpose(w_hh)            # (H, 3H)
    bih = b_ih.reshape(1, 3 * H)
    bhh = b_hh.reshape(1, 3 * H)
    return (embedding.astype(jnp.float32), wih_t, whh_t, bih, bhh)


def encoder_rnn_gru_sequence(tokens, hidden0, params):
    """Run the GRU EncoderRNN over a whole token sequence in ONE pallas_call.

    tokens:  int32 (seq_len,);  hidden0: float32 (1, 1, H)  (== initHidden()).
    Returns (outputs, hidden): outputs (seq_len, 1, H), hidden (1, 1, H).
    With seq_len == 1 this is exactly EncoderRNN.forward (GRU branch).
    """
    emb, wih_t, whh_t, bih, bhh = params
    V, H = emb.shape
    seq_len = tokens.shape[0]
    h0 = hidden0.reshape(1, H)

    grid_spec = pltpu.PrefetchScalarGridSpec(
        num_scalar_prefetch=1,
        grid=(1,),                                              # single invocation
        in_specs=[
            pl.BlockSpec((V, H), lambda i, tok: (0, 0)),        # embedding, resident
            pl.BlockSpec((1, H), lambda i, tok: (0, 0)),        # h0
            pl.BlockSpec((H, 3 * H), lambda i, tok: (0, 0)),    # W_ih^T
            pl.BlockSpec((H, 3 * H), lambda i, tok: (0, 0)),    # W_hh^T
            pl.BlockSpec((1, 3 * H), lambda i, tok: (0, 0)),    # b_ih
            pl.BlockSpec((1, 3 * H), lambda i, tok: (0, 0)),    # b_hh
        ],
        out_specs=pl.BlockSpec((seq_len, H), lambda i, tok: (0, 0)),  # one dense slab
        scratch_shapes=[
            pltpu.VMEM((seq_len, H), jnp.float32),       # gathered embeddings
            pltpu.VMEM((seq_len, 3 * H), jnp.float32),   # precomputed gi
        ],
    )

    outputs = pl.pallas_call(
        _fused_gru_kernel,
        grid_spec=grid_spec,
        out_shape=jax.ShapeDtypeStruct((seq_len, H), jnp.float32),
        compiler_params=pltpu.CompilerParams(
            dimension_semantics=("arbitrary",)),         # serial recurrence
    )(tokens, emb, h0, wih_t, whh_t, bih, bhh)

    hidden = outputs[seq_len - 1].reshape(1, 1, H)       # output[t] == new hidden
    return outputs.reshape(seq_len, 1, H), hidden


def encoder_rnn_forward(token, hidden, params):
    """Single-step forward, matching the module's (input, hidden) -> (output, hidden)."""
    outputs, hidden_new = encoder_rnn_gru_sequence(token.reshape(1), hidden, params)
    return outputs.reshape(1, 1, -1), hidden_new


def _reference_gru_sequence(tokens, hidden0, embedding, w_ih, w_hh, b_ih, b_hh):
    H = embedding.shape[1]
    h = hidden0.reshape(1, H)
    outs = []
    for t in range(int(tokens.shape[0])):
        x = embedding[tokens[t]].reshape(1, H)
        gi = x @ w_ih.T + b_ih
        gh = h @ w_hh.T + b_hh
        r = jax.nn.sigmoid(gi[:, :H] + gh[:, :H])
        z = jax.nn.sigmoid(gi[:, H:2 * H] + gh[:, H:2 * H])
        n = jnp.tanh(gi[:, 2 * H:] + r * gh[:, 2 * H:])
        h = (1.0 - z) * n + z * h
        outs.append(h)
    return jnp.stack(outs, axis=0), h.reshape(1, 1, H)


if __name__ == "__main__":
    INPUT_SIZE = 50     # vocab size
    HIDDEN_SIZE = 32    # hidden_size
    SEQ_LEN = 8

    key = jax.random.PRNGKey(0)
    k_emb, k_wih, k_whh, k_bih, k_bhh, k_tok = jax.random.split(key, 6)

    # nn.Embedding init ~ N(0,1); nn.GRU init ~ U(-1/sqrt(H), 1/sqrt(H))
    bound = 1.0 / jnp.sqrt(jnp.float32(HIDDEN_SIZE))
    embedding = jax.random.normal(k_emb, (INPUT_SIZE, HIDDEN_SIZE), jnp.float32)
    w_ih = jax.random.uniform(k_wih, (3 * HIDDEN_SIZE, HIDDEN_SIZE), jnp.float32,
                              -bound, bound)
    w_hh = jax.random.uniform(k_whh, (3 * HIDDEN_SIZE, HIDDEN_SIZE), jnp.float32,
                              -bound, bound)
    b_ih = jax.random.uniform(k_bih, (3 * HIDDEN_SIZE,), jnp.float32, -bound, bound)
    b_hh = jax.random.uniform(k_bhh, (3 * HIDDEN_SIZE,), jnp.float32, -bound, bound)

    params = prepare_params(embedding, w_ih, w_hh, b_ih, b_hh)   # hoisted, done once

    tokens = jax.random.randint(k_tok, (SEQ_LEN,), 0, INPUT_SIZE, dtype=jnp.int32)
    hidden0 = jnp.zeros((1, 1, HIDDEN_SIZE), jnp.float32)        # initHidden()

    fused = jax.jit(encoder_rnn_gru_sequence)
    outputs, hidden = fused(tokens, hidden0, params)
    jax.block_until_ready((outputs, hidden))

    ref_outs, ref_hidden = _reference_gru_sequence(
        tokens, hidden0, embedding, w_ih, w_hh, b_ih, b_hh)
    assert outputs.shape == (SEQ_LEN, 1, HIDDEN_SIZE)
    assert hidden.shape == (1, 1, HIDDEN_SIZE)
    assert jnp.allclose(outputs, ref_outs, atol=1e-4, rtol=1e-4), "sequence output mismatch"
    assert jnp.allclose(hidden, ref_hidden, atol=1e-4, rtol=1e-4), "final hidden mismatch"

    # Single-step call, exactly the module's forward signature/semantics.
    out1, hid1 = encoder_rnn_forward(tokens[:1], hidden0, params)
    jax.block_until_ready((out1, hid1))
    assert out1.shape == (1, 1, HIDDEN_SIZE) and hid1.shape == (1, 1, HIDDEN_SIZE)
    assert jnp.allclose(out1, ref_outs[0].reshape(1, 1, HIDDEN_SIZE), atol=1e-4, rtol=1e-4)
    assert jnp.allclose(hid1, out1), "single-step output/hidden should match (GRU)"

    # TODO(synk): 'lstm' / 'bi-lstm' branches are not taken by the default
    # forward path; only the GRU branch is implemented here.
    print("KERNEL_OK")
</pallas_src>

<mosaic_0001>
module attributes {stable_mosaic.version = 11 : i64} {
  func.func @_fused_gru_kernel(%arg0: i32, %arg1: memref<8xi32, #tpu.memory_space<smem>>, %arg2: memref<50x32xf32, #tpu.memory_space<vmem>>, %arg3: memref<1x32xf32, #tpu.memory_space<vmem>>, %arg4: memref<32x96xf32, #tpu.memory_space<vmem>>, %arg5: memref<32x96xf32, #tpu.memory_space<vmem>>, %arg6: memref<1x96xf32, #tpu.memory_space<vmem>>, %arg7: memref<1x96xf32, #tpu.memory_space<vmem>>, %arg8: memref<8x32xf32, #tpu.memory_space<vmem>>, %arg9: memref<8x32xf32, #tpu.memory_space<vmem>>, %arg10: memref<8x96xf32, #tpu.memory_space<vmem>>) attributes {dimension_semantics = [#tpu.dimension_semantics<arbitrary>], iteration_bounds = array<i64: 1>, scalar_prefetch = 1 : i64, scratch_operands = 2 : i64, tpu.core_type = #tpu.core_type<tc>, window_params = [{pipeline_mode = #tpu.pipeline_mode<synchronous>, transform_indices = @transform_0, window_bounds = array<i64: 50, 32>}, {pipeline_mode = #tpu.pipeline_mode<synchronous>, transform_indices = @transform_1, window_bounds = array<i64: 1, 32>}, {pipeline_mode = #tpu.pipeline_mode<synchronous>, transform_indices = @transform_2, window_bounds = array<i64: 32, 96>}, {pipeline_mode = #tpu.pipeline_mode<synchronous>, transform_indices = @transform_3, window_bounds = array<i64: 32, 96>}, {pipeline_mode = #tpu.pipeline_mode<synchronous>, transform_indices = @transform_4, window_bounds = array<i64: 1, 96>}, {pipeline_mode = #tpu.pipeline_mode<synchronous>, transform_indices = @transform_5, window_bounds = array<i64: 1, 96>}, {pipeline_mode = #tpu.pipeline_mode<synchronous>, transform_indices = @transform_6, window_bounds = array<i64: 8, 32>}]} {
    %c0_i32 = arith.constant 0 : i32
    %0 = arith.index_cast %c0_i32 : i32 to index
    %1 = memref.load %arg1[%0] : memref<8xi32, #tpu.memory_space<smem>>
    %2 = arith.index_cast %1 : i32 to index
    %c0 = arith.constant 0 : index
    %3 = vector.load %arg2[%2, %c0] : memref<50x32xf32, #tpu.memory_space<vmem>>, vector<1x32xf32>
    %4 = arith.index_cast %c0_i32 : i32 to index
    %c0_0 = arith.constant 0 : index
    %5 = vector.load %arg9[%4, %c0_0] : memref<8x32xf32, #tpu.memory_space<vmem>>, vector<1x32xf32>
    tpu.vector_store %arg9[%4, %c0_0], %3 {strides = array<i32>} : memref<8x32xf32, #tpu.memory_space<vmem>>, vector<1x32xf32>,
    %c1_i32 = arith.constant 1 : i32
    %6 = arith.index_cast %c1_i32 : i32 to index
    %7 = memref.load %arg1[%6] : memref<8xi32, #tpu.memory_space<smem>>
    %8 = arith.index_cast %7 : i32 to index
    %c0_1 = arith.constant 0 : index
    %9 = vector.load %arg2[%8, %c0_1] : memref<50x32xf32, #tpu.memory_space<vmem>>, vector<1x32xf32>
    %10 = arith.index_cast %c1_i32 : i32 to index
    %c0_2 = arith.constant 0 : index
    %11 = vector.load %arg9[%10, %c0_2] : memref<8x32xf32, #tpu.memory_space<vmem>>, vector<1x32xf32>
    tpu.vector_store %arg9[%10, %c0_2], %9 {strides = array<i32>} : memref<8x32xf32, #tpu.memory_space<vmem>>, vector<1x32xf32>,
    %c2_i32 = arith.constant 2 : i32
    %12 = arith.index_cast %c2_i32 : i32 to index
    %13 = memref.load %arg1[%12] : memref<8xi32, #tpu.memory_space<smem>>
    %14 = arith.index_cast %13 : i32 to index
    %c0_3 = arith.constant 0 : index
    %15 = vector.load %arg2[%14, %c0_3] : memref<50x32xf32, #tpu.memory_space<vmem>>, vector<1x32xf32>
    %16 = arith.index_cast %c2_i32 : i32 to index
    %c0_4 = arith.constant 0 : index
    %17 = vector.load %arg9[%16, %c0_4] : memref<8x32xf32, #tpu.memory_space<vmem>>, vector<1x32xf32>
    tpu.vector_store %arg9[%16, %c0_4], %15 {strides = array<i32>} : memref<8x32xf32, #tpu.memory_space<vmem>>, vector<1x32xf32>,
    %c3_i32 = arith.constant 3 : i32
    %18 = arith.index_cast %c3_i32 : i32 to index
    %19 = memref.load %arg1[%18] : memref<8xi32, #tpu.memory_space<smem>>
    %20 = arith.index_cast %19 : i32 to index
    %c0_5 = arith.constant 0 : index
    %21 = vector.load %arg2[%20, %c0_5] : memref<50x32xf32, #tpu.memory_space<vmem>>, vector<1x32xf32>
    %22 = arith.index_cast %c3_i32 : i32 to index
    %c0_6 = arith.constant 0 : index
    %23 = vector.load %arg9[%22, %c0_6] : memref<8x32xf32, #tpu.memory_space<vmem>>, vector<1x32xf32>
    tpu.vector_store %arg9[%22, %c0_6], %21 {strides = array<i32>} : memref<8x32xf32, #tpu.memory_space<vmem>>, vector<1x32xf32>,
    %c4_i32 = arith.constant 4 : i32
    %24 = arith.index_cast %c4_i32 : i32 to index
    %25 = memref.load %arg1[%24] : memref<8xi32, #tpu.memory_space<smem>>
    %26 = arith.index_cast %25 : i32 to index
    %c0_7 = arith.constant 0 : index
    %27 = vector.load %arg2[%26, %c0_7] : memref<50x32xf32, #tpu.memory_space<vmem>>, vector<1x32xf32>
    %28 = arith.index_cast %c4_i32 : i32 to index
    %c0_8 = arith.constant 0 : index
    %29 = vector.load %arg9[%28, %c0_8] : memref<8x32xf32, #tpu.memory_space<vmem>>, vector<1x32xf32>
    tpu.vector_store %arg9[%28, %c0_8], %27 {strides = array<i32>} : memref<8x32xf32, #tpu.memory_space<vmem>>, vector<1x32xf32>,
    %c5_i32 = arith.constant 5 : i32
    %30 = arith.index_cast %c5_i32 : i32 to index
    %31 = memref.load %arg1[%30] : memref<8xi32, #tpu.memory_space<smem>>
    %32 = arith.index_cast %31 : i32 to index
    %c0_9 = arith.constant 0 : index
    %33 = vector.load %arg2[%32, %c0_9] : memref<50x32xf32, #tpu.memory_space<vmem>>, vector<1x32xf32>
    %34 = arith.index_cast %c5_i32 : i32 to index
    %c0_10 = arith.constant 0 : index
    %35 = vector.load %arg9[%34, %c0_10] : memref<8x32xf32, #tpu.memory_space<vmem>>, vector<1x32xf32>
    tpu.vector_store %arg9[%34, %c0_10], %33 {strides = array<i32>} : memref<8x32xf32, #tpu.memory_space<vmem>>, vector<1x32xf32>,
    %c6_i32 = arith.constant 6 : i32
    %36 = arith.index_cast %c6_i32 : i32 to index
    %37 = memref.load %arg1[%36] : memref<8xi32, #tpu.memory_space<smem>>
    %38 = arith.index_cast %37 : i32 to index
    %c0_11 = arith.constant 0 : index
    %39 = vector.load %arg2[%38, %c0_11] : memref<50x32xf32, #tpu.memory_space<vmem>>, vector<1x32xf32>
    %40 = arith.index_cast %c6_i32 : i32 to index
    %c0_12 = arith.constant 0 : index
    %41 = vector.load %arg9[%40, %c0_12] : memref<8x32xf32, #tpu.memory_space<vmem>>, vector<1x32xf32>
    tpu.vector_store %arg9[%40, %c0_12], %39 {strides = array<i32>} : memref<8x32xf32, #tpu.memory_space<vmem>>, vector<1x32xf32>,
    %c7_i32 = arith.constant 7 : i32
    %42 = arith.index_cast %c7_i32 : i32 to index
    %43 = memref.load %arg1[%42] : memref<8xi32, #tpu.memory_space<smem>>
    %44 = arith.index_cast %43 : i32 to index
    %c0_13 = arith.constant 0 : index
    %45 = vector.load %arg2[%44, %c0_13] : memref<50x32xf32, #tpu.memory_space<vmem>>, vector<1x32xf32>
    %46 = arith.index_cast %c7_i32 : i32 to index
    %c0_14 = arith.constant 0 : index
    %47 = vector.load %arg9[%46, %c0_14] : memref<8x32xf32, #tpu.memory_space<vmem>>, vector<1x32xf32>
    tpu.vector_store %arg9[%46, %c0_14], %45 {strides = array<i32>} : memref<8x32xf32, #tpu.memory_space<vmem>>, vector<1x32xf32>,
    %c8_i32 = arith.constant 8 : i32
    %c0_15 = arith.constant 0 : index
    %c0_16 = arith.constant 0 : index
    %48 = vector.load %arg9[%c0_15, %c0_16] : memref<8x32xf32, #tpu.memory_space<vmem>>, vector<8x32xf32>
    %c0_17 = arith.constant 0 : index
    %c0_18 = arith.constant 0 : index
    %49 = vector.load %arg4[%c0_17, %c0_18] : memref<32x96xf32, #tpu.memory_space<vmem>>, vector<32x96xf32>
    %cst = arith.constant dense<0.000000e+00> : vector<8x96xf32>
    %50 = tpu.matmul %48, %49, %cst {dimension_numbers = #tpu.dot_dimension_numbers<[1], [0], [0], [1], [0, 0, 1, 1], [], []>} : vector<8x32xf32>, vector<32x96xf32>, vector<8x96xf32> -> vector<8x96xf32>
    %c0_19 = arith.constant 0 : index
    %c0_20 = arith.constant 0 : index
    %51 = vector.load %arg6[%c0_19, %c0_20] : memref<1x96xf32, #tpu.memory_space<vmem>>, vector<1x96xf32>
    %52 = vector.broadcast %51 : vector<1x96xf32> to vector<8x96xf32>
    %53 = arith.addf %50, %52 : vector<8x96xf32>
    %c0_21 = arith.constant 0 : index
    %c0_22 = arith.constant 0 : index
    %54 = vector.load %arg10[%c0_21, %c0_22] : memref<8x96xf32, #tpu.memory_space<vmem>>, vector<8x96xf32>
    tpu.vector_store %arg10[%c0_21, %c0_22], %53 {strides = array<i32>} : memref<8x96xf32, #tpu.memory_space<vmem>>, vector<8x96xf32>,
    %c0_23 = arith.constant 0 : index
    %c0_24 = arith.constant 0 : index
    %55 = vector.load %arg5[%c0_23, %c0_24] : memref<32x96xf32, #tpu.memory_space<vmem>>, vector<32x96xf32>
    %c0_25 = arith.constant 0 : index
    %c0_26 = arith.constant 0 : index
    %56 = vector.load %arg7[%c0_25, %c0_26] : memref<1x96xf32, #tpu.memory_space<vmem>>, vector<1x96xf32>
    %c0_27 = arith.constant 0 : index
    %c0_28 = arith.constant 0 : index
    %57 = vector.load %arg3[%c0_27, %c0_28] : memref<1x32xf32, #tpu.memory_space<vmem>>, vector<1x32xf32>
    %c0_i32_29 = arith.constant 0 : i32
    %58 = arith.index_cast %c0_i32_29 : i32 to index
    %c0_30 = arith.constant 0 : index
    %59 = vector.load %arg10[%58, %c0_30] : memref<8x96xf32, #tpu.memory_space<vmem>>, vector<1x96xf32>
    %cst_31 = arith.constant dense<0.000000e+00> : vector<1x96xf32>
    %60 = tpu.matmul %57, %55, %cst_31 {dimension_numbers = #tpu.dot_dimension_numbers<[1], [0], [0], [1], [0, 0, 1, 1], [], []>} : vector<1x32xf32>, vector<32x96xf32>, vector<1x96xf32> -> vector<1x96xf32>
    %61 = arith.addf %60, %56 : vector<1x96xf32>
    %62 = vector.extract_strided_slice %59 {offsets = [0, 0], sizes = [1, 32], strides = [1, 1]} : vector<1x96xf32> to vector<1x32xf32>
    %63 = vector.extract_strided_slice %61 {offsets = [0, 0], sizes = [1, 32], strides = [1, 1]} : vector<1x96xf32> to vector<1x32xf32>
    %64 = arith.addf %62, %63 : vector<1x32xf32>
    %65 = arith.negf %64 : vector<1x32xf32>
    %66 = math.exp %65 : vector<1x32xf32>
    %cst_32 = arith.constant 1.000000e+00 : f32
    %67 = vector.broadcast %cst_32 : f32 to vector<1x32xf32>
    %68 = arith.addf %67, %66 : vector<1x32xf32>
    %69 = arith.divf %67, %68 : vector<1x32xf32>
    %70 = vector.extract_strided_slice %59 {offsets = [0, 32], sizes = [1, 32], strides = [1, 1]} : vector<1x96xf32> to vector<1x32xf32>
    %71 = vector.extract_strided_slice %61 {offsets = [0, 32], sizes = [1, 32], strides = [1, 1]} : vector<1x96xf32> to vector<1x32xf32>
    %72 = arith.addf %70, %71 : vector<1x32xf32>
    %73 = arith.negf %72 : vector<1x32xf32>
    %74 = math.exp %73 : vector<1x32xf32>
    %cst_33 = arith.constant 1.000000e+00 : f32
    %75 = vector.broadcast %cst_33 : f32 to vector<1x32xf32>
    %76 = arith.addf %75, %74 : vector<1x32xf32>
    %77 = arith.divf %75, %76 : vector<1x32xf32>
    %78 = vector.extract_strided_slice %59 {offsets = [0, 64], sizes = [1, 32], strides = [1, 1]} : vector<1x96xf32> to vector<1x32xf32>
    %79 = vector.extract_strided_slice %61 {offsets = [0, 64], sizes = [1, 32], strides = [1, 1]} : vector<1x96xf32> to vector<1x32xf32>
    %80 = arith.mulf %69, %79 : vector<1x32xf32>
    %81 = arith.addf %78, %80 : vector<1x32xf32>
    %82 = math.tanh %81 : vector<1x32xf32>
    %cst_34 = arith.constant 1.000000e+00 : f32
    %83 = vector.broadcast %cst_34 : f32 to vector<1x32xf32>
    %84 = arith.subf %83, %77 : vector<1x32xf32>
    %85 = arith.mulf %84, %82 : vector<1x32xf32>
    %86 = arith.mulf %77, %57 : vector<1x32xf32>
    %87 = arith.addf %85, %86 : vector<1x32xf32>
    %88 = arith.index_cast %c0_i32_29 : i32 to index
    %c0_35 = arith.constant 0 : index
    %89 = vector.load %arg8[%88, %c0_35] : memref<8x32xf32, #tpu.memory_space<vmem>>, vector<1x32xf32>
    tpu.vector_store %arg8[%88, %c0_35], %87 {strides = array<i32>} : memref<8x32xf32, #tpu.memory_space<vmem>>, vector<1x32xf32>,
    %c1_i32_36 = arith.constant 1 : i32
    %90 = arith.index_cast %c1_i32_36 : i32 to index
    %c0_37 = arith.constant 0 : index
    %91 = vector.load %arg10[%90, %c0_37] : memref<8x96xf32, #tpu.memory_space<vmem>>, vector<1x96xf32>
    %cst_38 = arith.constant dense<0.000000e+00> : vector<1x96xf32>
    %92 = tpu.matmul %87, %55, %cst_38 {dimension_numbers = #tpu.dot_dimension_numbers<[1], [0], [0], [1], [0, 0, 1, 1], [], []>} : vector<1x32xf32>, vector<32x96xf32>, vector<1x96xf32> -> vector<1x96xf32>
    %93 = arith.addf %92, %56 : vector<1x96xf32>
    %94 = vector.extract_strided_slice %91 {offsets = [0, 0], sizes = [1, 32], strides = [1, 1]} : vector<1x96xf32> to vector<1x32xf32>
    %95 = vector.extract_strided_slice %93 {offsets = [0, 0], sizes = [1, 32], strides = [1, 1]} : vector<1x96xf32> to vector<1x32xf32>
    %96 = arith.addf %94, %95 : vector<1x32xf32>
    %97 = arith.negf %96 : vector<1x32xf32>
    %98 = math.exp %97 : vector<1x32xf32>
    %cst_39 = arith.constant 1.000000e+00 : f32
    %99 = vector.broadcast %cst_39 : f32 to vector<1x32xf32>
    %100 = arith.addf %99, %98 : vector<1x32xf32>
    %101 = arith.divf %99, %100 : vector<1x32xf32>
    %102 = vector.extract_strided_slice %91 {offsets = [0, 32], sizes = [1, 32], strides = [1, 1]} : vector<1x96xf32> to vector<1x32xf32>
    %103 = vector.extract_strided_slice %93 {offsets = [0, 32], sizes = [1, 32], strides = [1, 1]} : vector<1x96xf32> to vector<1x32xf32>
    %104 = arith.addf %102, %103 : vector<1x32xf32>
    %105 = arith.negf %104 : vector<1x32xf32>
    %106 = math.exp %105 : vector<1x32xf32>
    %cst_40 = arith.constant 1.000000e+00 : f32
    %107 = vector.broadcast %cst_40 : f32 to vector<1x32xf32>
    %108 = arith.addf %107, %106 : vector<1x32xf32>
    %109 = arith.divf %107, %108 : vector<1x32xf32>
    %110 = vector.extract_strided_slice %91 {offsets = [0, 64], sizes = [1, 32], strides = [1, 1]} : vector<1x96xf32> to vector<1x32xf32>
    %111 = vector.extract_strided_slice %93 {offsets = [0, 64], sizes = [1, 32], strides = [1, 1]} : vector<1x96xf32> to vector<1x32xf32>
    %112 = arith.mulf %101, %111 : vector<1x32xf32>
    %113 = arith.addf %110, %112 : vector<1x32xf32>
    %114 = math.tanh %113 : vector<1x32xf32>
    %cst_41 = arith.constant 1.000000e+00 : f32
    %115 = vector.broadcast %cst_41 : f32 to vector<1x32xf32>
    %116 = arith.subf %115, %109 : vector<1x32xf32>
    %117 = arith.mulf %116, %114 : vector<1x32xf32>
    %118 = arith.mulf %109, %87 : vector<1x32xf32>
    %119 = arith.addf %117, %118 : vector<1x32xf32>
    %120 = arith.index_cast %c1_i32_36 : i32 to index
    %c0_42 = arith.constant 0 : index
    %121 = vector.load %arg8[%120, %c0_42] : memref<8x32xf32, #tpu.memory_space<vmem>>, vector<1x32xf32>
    tpu.vector_store %arg8[%120, %c0_42], %119 {strides = array<i32>} : memref<8x32xf32, #tpu.memory_space<vmem>>, vector<1x32xf32>,
    %c2_i32_43 = arith.constant 2 : i32
    %122 = arith.index_cast %c2_i32_43 : i32 to index
    %c0_44 = arith.constant 0 : index
    %123 = vector.load %arg10[%122, %c0_44] : memref<8x96xf32, #tpu.memory_space<vmem>>, vector<1x96xf32>
    %cst_45 = arith.constant dense<0.000000e+00> : vector<1x96xf32>
    %124 = tpu.matmul %119, %55, %cst_45 {dimension_numbers = #tpu.dot_dimension_numbers<[1], [0], [0], [1], [0, 0, 1, 1], [], []>} : vector<1x32xf32>, vector<32x96xf32>, vector<1x96xf32> -> vector<1x96xf32>
    %125 = arith.addf %124, %56 : vector<1x96xf32>
    %126 = vector.extract_strided_slice %123 {offsets = [0, 0], sizes = [1, 32], strides = [1, 1]} : vector<1x96xf32> to vector<1x32xf32>
    %127 = vector.extract_strided_slice %125 {offsets = [0, 0], sizes = [1, 32], strides = [1, 1]} : vector<1x96xf32> to vector<1x32xf32>
    %128 = arith.addf %126, %127 : vector<1x32xf32>
    %129 = arith.negf %128 : vector<1x32xf32>
    %130 = math.exp %129 : vector<1x32xf32>
    %cst_46 = arith.constant 1.000000e+00 : f32
    %131 = vector.broadcast %cst_46 : f32 to vector<1x32xf32>
    %132 = arith.addf %131, %130 : vector<1x32xf32>
    %133 = arith.divf %131, %132 : vector<1x32xf32>
    %134 = vector.extract_strided_slice %123 {offsets = [0, 32], sizes = [1, 32], strides = [1, 1]} : vector<1x96xf32> to vector<1x32xf32>
    %135 = vector.extract_strided_slice %125 {offsets = [0, 32], sizes = [1, 32], strides = [1, 1]} : vector<1x96xf32> to vector<1x32xf32>
    %136 = arith.addf %134, %135 : vector<1x32xf32>
    %137 = arith.negf %136 : vector<1x32xf32>
    %138 = math.exp %137 : vector<1x32xf32>
    %cst_47 = arith.constant 1.000000e+00 : f32
    %139 = vector.broadcast %cst_47 : f32 to vector<1x32xf32>
    %140 = arith.addf %139, %138 : vector<1x32xf32>
    %141 = arith.divf %139, %140 : vector<1x32xf32>
    %142 = vector.extract_strided_slice %123 {offsets = [0, 64], sizes = [1, 32], strides = [1, 1]} : vector<1x96xf32> to vector<1x32xf32>
    %143 = vector.extract_strided_slice %125 {offsets = [0, 64], sizes = [1, 32], strides = [1, 1]} : vector<1x96xf32> to vector<1x32xf32>
    %144 = arith.mulf %133, %143 : vector<1x32xf32>
    %145 = arith.addf %142, %144 : vector<1x32xf32>
    %146 = math.tanh %145 : vector<1x32xf32>
    %cst_48 = arith.constant 1.000000e+00 : f32
    %147 = vector.broadcast %cst_48 : f32 to vector<1x32xf32>
    %148 = arith.subf %147, %141 : vector<1x32xf32>
    %149 = arith.mulf %148, %146 : vector<1x32xf32>
    %150 = arith.mulf %141, %119 : vector<1x32xf32>
    %151 = arith.addf %149, %150 : vector<1x32xf32>
    %152 = arith.index_cast %c2_i32_43 : i32 to index
    %c0_49 = arith.constant 0 : index
    %153 = vector.load %arg8[%152, %c0_49] : memref<8x32xf32, #tpu.memory_space<vmem>>, vector<1x32xf32>
    tpu.vector_store %arg8[%152, %c0_49], %151 {strides = array<i32>} : memref<8x32xf32, #tpu.memory_space<vmem>>, vector<1x32xf32>,
    %c3_i32_50 = arith.constant 3 : i32
    %154 = arith.index_cast %c3_i32_50 : i32 to index
    %c0_51 = arith.constant 0 : index
    %155 = vector.load %arg10[%154, %c0_51] : memref<8x96xf32, #tpu.memory_space<vmem>>, vector<1x96xf32>
    %cst_52 = arith.constant dense<0.000000e+00> : vector<1x96xf32>
    %156 = tpu.matmul %151, %55, %cst_52 {dimension_numbers = #tpu.dot_dimension_numbers<[1], [0], [0], [1], [0, 0, 1, 1], [], []>} : vector<1x32xf32>, vector<32x96xf32>, vector<1x96xf32> -> vector<1x96xf32>
    %157 = arith.addf %156, %56 : vector<1x96xf32>
    %158 = vector.extract_strided_slice %155 {offsets = [0, 0], sizes = [1, 32], strides = [1, 1]} : vector<1x96xf32> to vector<1x32xf32>
    %159 = vector.extract_strided_slice %157 {offsets = [0, 0], sizes = [1, 32], strides = [1, 1]} : vector<1x96xf32> to vector<1x32xf32>
    %160 = arith.addf %158, %159 : vector<1x32xf32>
    %161 = arith.negf %160 : vector<1x32xf32>
    %162 = math.exp %161 : vector<1x32xf32>
    %cst_53 = arith.constant 1.000000e+00 : f32
    %163 = vector.broadcast %cst_53 : f32 to vector<1x32xf32>
    %164 = arith.addf %163, %162 : vector<1x32xf32>
    %165 = arith.divf %163, %164 : vector<1x32xf32>
    %166 = vector.extract_strided_slice %155 {offsets = [0, 32], sizes = [1, 32], strides = [1, 1]} : vector<1x96xf32> to vector<1x32xf32>
    %167 = vector.extract_strided_slice %157 {offsets = [0, 32], sizes = [1, 32], strides = [1, 1]} : vector<1x96xf32> to vector<1x32xf32>
    %168 = arith.addf %166, %167 : vector<1x32xf32>
    %169 = arith.negf %168 : vector<1x32xf32>
    %170 = math.exp %169 : vector<1x32xf32>
    %cst_54 = arith.constant 1.000000e+00 : f32
    %171 = vector.broadcast %cst_54 : f32 to vector<1x32xf32>
    %172 = arith.addf %171, %170 : vector<1x32xf32>
    %173 = arith.divf %171, %172 : vector<1x32xf32>
    %174 = vector.extract_strided_slice %155 {offsets = [0, 64], sizes = [1, 32], strides = [1, 1]} : vector<1x96xf32> to vector<1x32xf32>
    %175 = vector.extract_strided_slice %157 {offsets = [0, 64], sizes = [1, 32], strides = [1, 1]} : vector<1x96xf32> to vector<1x32xf32>
    %176 = arith.mulf %165, %175 : vector<1x32xf32>
    %177 = arith.addf %174, %176 : vector<1x32xf32>
    %178 = math.tanh %177 : vector<1x32xf32>
    %cst_55 = arith.constant 1.000000e+00 : f32
    %179 = vector.broadcast %cst_55 : f32 to vector<1x32xf32>
    %180 = arith.subf %179, %173 : vector<1x32xf32>
    %181 = arith.mulf %180, %178 : vector<1x32xf32>
    %182 = arith.mulf %173, %151 : vector<1x32xf32>
    %183 = arith.addf %181, %182 : vector<1x32xf32>
    %184 = arith.index_cast %c3_i32_50 : i32 to index
    %c0_56 = arith.constant 0 : index
    %185 = vector.load %arg8[%184, %c0_56] : memref<8x32xf32, #tpu.memory_space<vmem>>, vector<1x32xf32>
    tpu.vector_store %arg8[%184, %c0_56], %183 {strides = array<i32>} : memref<8x32xf32, #tpu.memory_space<vmem>>, vector<1x32xf32>,
    %c4_i32_57 = arith.constant 4 : i32
    %186 = arith.index_cast %c4_i32_57 : i32 to index
    %c0_58 = arith.constant 0 : index
    %187 = vector.load %arg10[%186, %c0_58] : memref<8x96xf32, #tpu.memory_space<vmem>>, vector<1x96xf32>
    %cst_59 = arith.constant dense<0.000000e+00> : vector<1x96xf32>
    %188 = tpu.matmul %183, %55, %cst_59 {dimension_numbers = #tpu.dot_dimension_numbers<[1], [0], [0], [1], [0, 0, 1, 1], [], []>} : vector<1x32xf32>, vector<32x96xf32>, vector<1x96xf32> -> vector<1x96xf32>
    %189 = arith.addf %188, %56 : vector<1x96xf32>
    %190 = vector.extract_strided_slice %187 {offsets = [0, 0], sizes = [1, 32], strides = [1, 1]} : vector<1x96xf32> to vector<1x32xf32>
    %191 = vector.extract_strided_slice %189 {offsets = [0, 0], sizes = [1, 32], strides = [1, 1]} : vector<1x96xf32> to vector<1x32xf32>
    %192 = arith.addf %190, %191 : vector<1x32xf32>
    %193 = arith.negf %192 : vector<1x32xf32>
    %194 = math.exp %193 : vector<1x32xf32>
    %cst_60 = arith.constant 1.000000e+00 : f32
    %195 = vector.broadcast %cst_60 : f32 to vector<1x32xf32>
    %196 = arith.addf %195, %194 : vector<1x32xf32>
    %197 = arith.divf %195, %196 : vector<1x32xf32>
    %198 = vector.extract_strided_slice %187 {offsets = [0, 32], sizes = [1, 32], strides = [1, 1]} : vector<1x96xf32> to vector<1x32xf32>
    %199 = vector.extract_strided_slice %189 {offsets = [0, 32], sizes = [1, 32], strides = [1, 1]} : vector<1x96xf32> to vector<1x32xf32>
    %200 = arith.addf %198, %199 : vector<1x32xf32>
    %201 = arith.negf %200 : vector<1x32xf32>
    %202 = math.exp %201 : vector<1x32xf32>
    %cst_61 = arith.constant 1.000000e+00 : f32
    %203 = vector.broadcast %cst_61 : f32 to vector<1x32xf32>
    %204 = arith.addf %203, %202 : vector<1x32xf32>
    %205 = arith.divf %203, %204 : vector<1x32xf32>
    %206 = vector.extract_strided_slice %187 {offsets = [0, 64], sizes = [1, 32], strides = [1, 1]} : vector<1x96xf32> to vector<1x32xf32>
    %207 = vector.extract_strided_slice %189 {offsets = [0, 64], sizes = [1, 32], strides = [1, 1]} : vector<1x96xf32> to vector<1x32xf32>
    %208 = arith.mulf %197, %207 : vector<1x32xf32>
    %209 = arith.addf %206, %208 : vector<1x32xf32>
    %210 = math.tanh %209 : vector<1x32xf32>
    %cst_62 = arith.constant 1.000000e+00 : f32
    %211 = vector.broadcast %cst_62 : f32 to vector<1x32xf32>
    %212 = arith.subf %211, %205 : vector<1x32xf32>
    %213 = arith.mulf %212, %210 : vector<1x32xf32>
    %214 = arith.mulf %205, %183 : vector<1x32xf32>
    %215 = arith.addf %213, %214 : vector<1x32xf32>
    %216 = arith.index_cast %c4_i32_57 : i32 to index
    %c0_63 = arith.constant 0 : index
    %217 = vector.load %arg8[%216, %c0_63] : memref<8x32xf32, #tpu.memory_space<vmem>>, vector<1x32xf32>
    tpu.vector_store %arg8[%216, %c0_63], %215 {strides = array<i32>} : memref<8x32xf32, #tpu.memory_space<vmem>>, vector<1x32xf32>,
    %c5_i32_64 = arith.constant 5 : i32
    %218 = arith.index_cast %c5_i32_64 : i32 to index
    %c0_65 = arith.constant 0 : index
    %219 = vector.load %arg10[%218, %c0_65] : memref<8x96xf32, #tpu.memory_space<vmem>>, vector<1x96xf32>
    %cst_66 = arith.constant dense<0.000000e+00> : vector<1x96xf32>
    %220 = tpu.matmul %215, %55, %cst_66 {dimension_numbers = #tpu.dot_dimension_numbers<[1], [0], [0], [1], [0, 0, 1, 1], [], []>} : vector<1x32xf32>, vector<32x96xf32>, vector<1x96xf32> -> vector<1x96xf32>
    %221 = arith.addf %220, %56 : vector<1x96xf32>
    %222 = vector.extract_strided_slice %219 {offsets = [0, 0], sizes = [1, 32], strides = [1, 1]} : vector<1x96xf32> to vector<1x32xf32>
    %223 = vector.extract_strided_slice %221 {offsets = [0, 0], sizes = [1, 32], strides = [1, 1]} : vector<1x96xf32> to vector<1x32xf32>
    %224 = arith.addf %222, %223 : vector<1x32xf32>
    %225 = arith.negf %224 : vector<1x32xf32>
    %226 = math.exp %225 : vector<1x32xf32>
    %cst_67 = arith.constant 1.000000e+00 : f32
    %227 = vector.broadcast %cst_67 : f32 to vector<1x32xf32>
    %228 = arith.addf %227, %226 : vector<1x32xf32>
    %229 = arith.divf %227, %228 : vector<1x32xf32>
    %230 = vector.extract_strided_slice %219 {offsets = [0, 32], sizes = [1, 32], strides = [1, 1]} : vector<1x96xf32> to vector<1x32xf32>
    %231 = vector.extract_strided_slice %221 {offsets = [0, 32], sizes = [1, 32], strides = [1, 1]} : vector<1x96xf32> to vector<1x32xf32>
    %232 = arith.addf %230, %231 : vector<1x32xf32>
    %233 = arith.negf %232 : vector<1x32xf32>
    %234 = math.exp %233 : vector<1x32xf32>
    %cst_68 = arith.constant 1.000000e+00 : f32
    %235 = vector.broadcast %cst_68 : f32 to vector<1x32xf32>
    %236 = arith.addf %235, %234 : vector<1x32xf32>
    %237 = arith.divf %235, %236 : vector<1x32xf32>
    %238 = vector.extract_strided_slice %219 {offsets = [0, 64], sizes = [1, 32], strides = [1, 1]} : vector<1x96xf32> to vector<1x32xf32>
    %239 = vector.extract_strided_slice %221 {offsets = [0, 64], sizes = [1, 32], strides = [1, 1]} : vector<1x96xf32> to vector<1x32xf32>
    %240 = arith.mulf %229, %239 : vector<1x32xf32>
    %241 = arith.addf %238, %240 : vector<1x32xf32>
    %242 = math.tanh %241 : vector<1x32xf32>
    %cst_69 = arith.constant 1.000000e+00 : f32
    %243 = vector.broadcast %cst_69 : f32 to vector<1x32xf32>
    %244 = arith.subf %243, %237 : vector<1x32xf32>
    %245 = arith.mulf %244, %242 : vector<1x32xf32>
    %246 = arith.mulf %237, %215 : vector<1x32xf32>
    %247 = arith.addf %245, %246 : vector<1x32xf32>
    %248 = arith.index_cast %c5_i32_64 : i32 to index
    %c0_70 = arith.constant 0 : index
    %249 = vector.load %arg8[%248, %c0_70] : memref<8x32xf32, #tpu.memory_space<vmem>>, vector<1x32xf32>
    tpu.vector_store %arg8[%248, %c0_70], %247 {strides = array<i32>} : memref<8x32xf32, #tpu.memory_space<vmem>>, vector<1x32xf32>,
    %c6_i32_71 = arith.constant 6 : i32
    %250 = arith.index_cast %c6_i32_71 : i32 to index
    %c0_72 = arith.constant 0 : index
    %251 = vector.load %arg10[%250, %c0_72] : memref<8x96xf32, #tpu.memory_space<vmem>>, vector<1x96xf32>
    %cst_73 = arith.constant dense<0.000000e+00> : vector<1x96xf32>
    %252 = tpu.matmul %247, %55, %cst_73 {dimension_numbers = #tpu.dot_dimension_numbers<[1], [0], [0], [1], [0, 0, 1, 1], [], []>} : vector<1x32xf32>, vector<32x96xf32>, vector<1x96xf32> -> vector<1x96xf32>
    %253 = arith.addf %252, %56 : vector<1x96xf32>
    %254 = vector.extract_strided_slice %251 {offsets = [0, 0], sizes = [1, 32], strides = [1, 1]} : vector<1x96xf32> to vector<1x32xf32>
    %255 = vector.extract_strided_slice %253 {offsets = [0, 0], sizes = [1, 32], strides = [1, 1]} : vector<1x96xf32> to vector<1x32xf32>
    %256 = arith.addf %254, %255 : vector<1x32xf32>
    %257 = arith.negf %256 : vector<1x32xf32>
    %258 = math.exp %257 : vector<1x32xf32>
    %cst_74 = arith.constant 1.000000e+00 : f32
    %259 = vector.broadcast %cst_74 : f32 to vector<1x32xf32>
    %260 = arith.addf %259, %258 : vector<1x32xf32>
    %261 = arith.divf %259, %260 : vector<1x32xf32>
    %262 = vector.extract_strided_slice %251 {offsets = [0, 32], sizes = [1, 32], strides = [1, 1]} : vector<1x96xf32> to vector<1x32xf32>
    %263 = vector.extract_strided_slice %253 {offsets = [0, 32], sizes = [1, 32], strides = [1, 1]} : vector<1x96xf32> to vector<1x32xf32>
    %264 = arith.addf %262, %263 : vector<1x32xf32>
    %265 = arith.negf %264 : vector<1x32xf32>
    %266 = math.exp %265 : vector<1x32xf32>
    %cst_75 = arith.constant 1.000000e+00 : f32
    %267 = vector.broadcast %cst_75 : f32 to vector<1x32xf32>
    %268 = arith.addf %267, %266 : vector<1x32xf32>
    %269 = arith.divf %267, %268 : vector<1x32xf32>
    %270 = vector.extract_strided_slice %251 {offsets = [0, 64], sizes = [1, 32], strides = [1, 1]} : vector<1x96xf32> to vector<1x32xf32>
    %271 = vector.extract_strided_slice %253 {offsets = [0, 64], sizes = [1, 32], strides = [1, 1]} : vector<1x96xf32> to vector<1x32xf32>
    %272 = arith.mulf %261, %271 : vector<1x32xf32>
    %273 = arith.addf %270, %272 : vector<1x32xf32>
    %274 = math.tanh %273 : vector<1x32xf32>
    %cst_76 = arith.constant 1.000000e+00 : f32
    %275 = vector.broadcast %cst_76 : f32 to vector<1x32xf32>
    %276 = arith.subf %275, %269 : vector<1x32xf32>
    %277 = arith.mulf %276, %274 : vector<1x32xf32>
    %278 = arith.mulf %269, %247 : vector<1x32xf32>
    %279 = arith.addf %277, %278 : vector<1x32xf32>
    %280 = arith.index_cast %c6_i32_71 : i32 to index
    %c0_77 = arith.constant 0 : index
    %281 = vector.load %arg8[%280, %c0_77] : memref<8x32xf32, #tpu.memory_space<vmem>>, vector<1x32xf32>
    tpu.vector_store %arg8[%280, %c0_77], %279 {strides = array<i32>} : memref<8x32xf32, #tpu.memory_space<vmem>>, vector<1x32xf32>,
    %c7_i32_78 = arith.constant 7 : i32
    %282 = arith.index_cast %c7_i32_78 : i32 to index
    %c0_79 = arith.constant 0 : index
    %283 = vector.load %arg10[%282, %c0_79] : memref<8x96xf32, #tpu.memory_space<vmem>>, vector<1x96xf32>
    %cst_80 = arith.constant dense<0.000000e+00> : vector<1x96xf32>
    %284 = tpu.matmul %279, %55, %cst_80 {dimension_numbers = #tpu.dot_dimension_numbers<[1], [0], [0], [1], [0, 0, 1, 1], [], []>} : vector<1x32xf32>, vector<32x96xf32>, vector<1x96xf32> -> vector<1x96xf32>
    %285 = arith.addf %284, %56 : vector<1x96xf32>
    %286 = vector.extract_strided_slice %283 {offsets = [0, 0], sizes = [1, 32], strides = [1, 1]} : vector<1x96xf32> to vector<1x32xf32>
    %287 = vector.extract_strided_slice %285 {offsets = [0, 0], sizes = [1, 32], strides = [1, 1]} : vector<1x96xf32> to vector<1x32xf32>
    %288 = arith.addf %286, %287 : vector<1x32xf32>
    %289 = arith.negf %288 : vector<1x32xf32>
    %290 = math.exp %289 : vector<1x32xf32>
    %cst_81 = arith.constant 1.000000e+00 : f32
    %291 = vector.broadcast %cst_81 : f32 to vector<1x32xf32>
    %292 = arith.addf %291, %290 : vector<1x32xf32>
    %293 = arith.divf %291, %292 : vector<1x32xf32>
    %294 = vector.extract_strided_slice %283 {offsets = [0, 32], sizes = [1, 32], strides = [1, 1]} : vector<1x96xf32> to vector<1x32xf32>
    %295 = vector.extract_strided_slice %285 {offsets = [0, 32], sizes = [1, 32], strides = [1, 1]} : vector<1x96xf32> to vector<1x32xf32>
    %296 = arith.addf %294, %295 : vector<1x32xf32>
    %297 = arith.negf %296 : vector<1x32xf32>
    %298 = math.exp %297 : vector<1x32xf32>
    %cst_82 = arith.constant 1.000000e+00 : f32
    %299 = vector.broadcast %cst_82 : f32 to vector<1x32xf32>
    %300 = arith.addf %299, %298 : vector<1x32xf32>
    %301 = arith.divf %299, %300 : vector<1x32xf32>
    %302 = vector.extract_strided_slice %283 {offsets = [0, 64], sizes = [1, 32], strides = [1, 1]} : vector<1x96xf32> to vector<1x32xf32>
    %303 = vector.extract_strided_slice %285 {offsets = [0, 64], sizes = [1, 32], strides = [1, 1]} : vector<1x96xf32> to vector<1x32xf32>
    %304 = arith.mulf %293, %303 : vector<1x32xf32>
    %305 = arith.addf %302, %304 : vector<1x32xf32>
    %306 = math.tanh %305 : vector<1x32xf32>
    %cst_83 = arith.constant 1.000000e+00 : f32
    %307 = vector.broadcast %cst_83 : f32 to vector<1x32xf32>
    %308 = arith.subf %307, %301 : vector<1x32xf32>
    %309 = arith.mulf %308, %306 : vector<1x32xf32>
    %310 = arith.mulf %301, %279 : vector<1x32xf32>
    %311 = arith.addf %309, %310 : vector<1x32xf32>
    %312 = arith.index_cast %c7_i32_78 : i32 to index
    %c0_84 = arith.constant 0 : index
    %313 = vector.load %arg8[%312, %c0_84] : memref<8x32xf32, #tpu.memory_space<vmem>>, vector<1x32xf32>
    tpu.vector_store %arg8[%312, %c0_84], %311 {strides = array<i32>} : memref<8x32xf32, #tpu.memory_space<vmem>>, vector<1x32xf32>,
    %c8_i32_85 = arith.constant 8 : i32
    return
  }
  func.func @transform_0(%arg0: i32, %arg1: memref<8xi32, #tpu.memory_space<smem>>) -> (i32, i32) {
    %c0_i32 = arith.constant 0 : i32
    %c0_i32_0 = arith.constant 0 : i32
    %c0_i32_1 = arith.constant 0 : i32
    return %c0_i32, %c0_i32_0 : i32, i32
  }
  func.func @transform_1(%arg0: i32, %arg1: memref<8xi32, #tpu.memory_space<smem>>) -> (i32, i32) {
    %c0_i32 = arith.constant 0 : i32
    %c0_i32_0 = arith.constant 0 : i32
    %c0_i32_1 = arith.constant 0 : i32
    return %c0_i32, %c0_i32_0 : i32, i32
  }
  func.func @transform_2(%arg0: i32, %arg1: memref<8xi32, #tpu.memory_space<smem>>) -> (i32, i32) {
    %c0_i32 = arith.constant 0 : i32
    %c0_i32_0 = arith.constant 0 : i32
    %c0_i32_1 = arith.constant 0 : i32
    return %c0_i32, %c0_i32_0 : i32, i32
  }
  func.func @transform_3(%arg0: i32, %arg1: memref<8xi32, #tpu.memory_space<smem>>) -> (i32, i32) {
    %c0_i32 = arith.constant 0 : i32
    %c0_i32_0 = arith.constant 0 : i32
    %c0_i32_1 = arith.constant 0 : i32
    return %c0_i32, %c0_i32_0 : i32, i32
  }
  func.func @transform_4(%arg0: i32, %arg1: memref<8xi32, #tpu.memory_space<smem>>) -> (i32, i32) {
    %c0_i32 = arith.constant 0 : i32
    %c0_i32_0 = arith.constant 0 : i32
    %c0_i32_1 = arith.constant 0 : i32
    return %c0_i32, %c0_i32_0 : i32, i32
  }
  func.func @transform_5(%arg0: i32, %arg1: memref<8xi32, #tpu.memory_space<smem>>) -> (i32, i32) {
    %c0_i32 = arith.constant 0 : i32
    %c0_i32_0 = arith.constant 0 : i32
    %c0_i32_1 = arith.constant 0 : i32
    return %c0_i32, %c0_i32_0 : i32, i32
  }
  func.func @transform_6(%arg0: i32, %arg1: memref<8xi32, #tpu.memory_space<smem>>) -> (i32, i32) {
    %c0_i32 = arith.constant 0 : i32
    %c0_i32_0 = arith.constant 0 : i32
    %c0_i32_1 = arith.constant 0 : i32
    return %c0_i32, %c0_i32_0 : i32, i32
  }
}

</mosaic_0001>

<bundles_post_ra>
// kernel: encoder_rnn_gru_sequence.1
= control target key start
LH: loop header
LB: loop body
LE: loop exit
PB: predicated region body
PF: predicated region fallthrough
CT: control target
= control target key end

     0   :  { %s1568_s0 = inlined_call_operand.vmem [shape: s32[8], index: 0, kind: input, shape index: {}]   ;;  %s1569_s1 = inlined_call_operand.vmem [shape: f32[50,32], index: 1, kind: input, shape index: {}]   ;;  %s1570_s2 = inlined_call_operand.vmem [shape: f32[1,32], index: 2, kind: input, shape index: {}]   ;;  %s1571_s3 = inlined_call_operand.vmem [shape: f32[32,96], index: 3, kind: input, shape index: {}]   ;;  %s1572_s4 = inlined_call_operand.vmem [shape: f32[32,96], index: 4, kind: input, shape index: {}]   ;;  %s1573_s5 = inlined_call_operand.vmem [shape: f32[1,96], index: 5, kind: input, shape index: {}]   ;;  %s1574_s6 = inlined_call_operand.vmem [shape: f32[1,96], index: 6, kind: input, shape index: {}]   ;;  %s1575_s7 = inlined_call_operand.vmem [shape: f32[8,32], index: 7, kind: output, shape index: {}]  }
   0x1   :  { %s12_s26 = sshll.u32 %s1568_s0, 4  ;;  %s13_s26 = int_to_ptr.vmem [resolvable:$true] %s12_s26 }
   0x2   :  { %s1287_s27 = scalar_lea.vmem %s13_s26, 16  ;;  %p1292_p1 = scmp.lt.s32.totalorder %s13_s26, %s13_s26 }
   0x3   :  { %p1288_p0 = scmp.ne.s32.totalorder %s13_s26, %s1287_s27  ;;  %p1293_p2 = scmp.lt.s32.totalorder %s1287_s27, %s1287_s27 }
   0x5   :  { %p1294_p3 = por %p1293_p2, %p1292_p1 }
   0x7   :  { %p1295_p4 = pnand %p1294_p3, %p1288_p0 }
   0x9   :  { %1298 = shalt.err (!%p1295_p4)  }
   0xa   :  { %s1301_s28 = smov [#allocation5]  }
   0xb   :  { %15 = dma.vmem_to_smem %s13_s26, 16, %s1301_s28, [#allocation4] }
   0xc   :  { %1299 = dma.done.wait [#allocation4], 16 }
   0xd   :  { %1300 = vsyncadd [#allocation4], 4294967280 }
   0xe   :  { %17 = sfence }
   0xf   :  { %v151_v0 = vld [vmem:[%s1572_s4] sm:$0xff]  ;;  %v152_v1 = vld [vmem:[%s1572_s4 + $0x8] sm:$0xff]  ;;  %v153_v2 = vld [vmem:[%s1572_s4 + $0x10] sm:$0xff]  ;;  %v1302_v3 = vmov 0.0|0.0   ;;  %s30_s17 = sld [smem:[#allocation5]]  ;;  %vm1303_vm0 = vmmov 0   ;;  %v255_v42 = vlaneseq }
  0x10   :  { %1184 = vmatprep.subr.bf16.mxu1 %v1302_v3  ;;  %v1361_v4 = vpack.c.bf16 %v152_v1, %v151_v0  ;;  %v154_v5 = vld [vmem:[%s1572_s4 + $0x18] sm:$0xff]  ;;  %1178 = vmatprep.subr.bf16.mxu0 %v1302_v3  ;;  %v64_v6 = vld [vmem:[%s1571_s3] sm:$0xff]  ;;  %v65_v7 = vld [vmem:[%s1571_s3 + $0x8] sm:$0xff]  ;;  %v1304_v9 = vmov 0.0   ;;  %s1009_s21 = sld [smem:[#allocation5 + $0x1]]  ;;  %s1010_s22 = sld [smem:[#allocation5 + $0x2]] }
  0x11   :  { %v1179_v8 = vpack.c.bf16 %v65_v7, %v64_v6  ;;  %1098 = vmatprep.mubr.msk.f32.mxu1 %vm1303_vm0, %v1304_v9  ;;  %v66_v10 = vld [vmem:[%s1571_s3 + $0x10] sm:$0xff]  ;;  %v67_v11 = vld [vmem:[%s1571_s3 + $0x18] sm:$0xff]  ;;  %1087 = vmatprep.mubr.msk.f32.mxu0 %vm1303_vm0, %v1304_v9  ;;  %v1384_v12 = vpack.c.bf16 %v154_v5, %v153_v2  ;;  %s1011_s23 = sld [smem:[#allocation5 + $0x3]]  ;;  %s1012_s24 = sld [smem:[#allocation5 + $0x4]]  ;;  %vm33_vm1 = vcmask 253952   ;;  %vm75_vm2 = vcmask 261120  }
  0x12   :  { %1186 = vmatpush3.bf16.msra.mxu1 %v1361_v4  ;;  %v1182_v13 = vpack.c.bf16 %v67_v11, %v66_v10  ;;  %s1388_s25 = sld [smem:[#allocation5 + $0x5]]  ;;  %s1390_s3 = sld [smem:[#allocation5 + $0x6]]  ;;  %v1398_v14 = vld [vmem:[%s1570_s2] sm:$0x1]  ;;  %vm149_vm3 = vcmask 785408   ;;  %v256_v43 = vshrl.u32 %v255_v42, 7 }
  0x13   :  { %1187 = vmatprep.subr.bf16.mxu1 %v1302_v3  ;;  %1180 = vmatpush3.bf16.msra.mxu0 %v1179_v8  ;;  %s1392_s26 = sld [smem:[#allocation5 + $0x7]]  ;;  %v1455_v24 = vld [vmem:[%s1574_s6] sm:$0x1]  ;;  %s1307_s6 = smov 32  }
  0x14   :  { %1181 = vmatprep.subr.bf16.mxu0 %v1302_v3  ;;  %v1016_v28 = vld [vmem:[%s1573_s5] ss:$0 sm:$0xff]  ;;  %v257_v44 = vsub.s32 0, %v256_v43  ;;  %s1306_s5 = smov 96  }
  0x15   :  { %s31_s8 = scalar_lea.vmem %s1569_s1, %s30_s17 }
  0x16   :  { %1189 = vmatpush3.bf16.msra.mxu1 %v1384_v12  ;;  %v32_v15 = vld [vmem:[%s31_s8] sm:$0x1]  ;;  %s36_s10 = scalar_lea.vmem %s1569_s1, %s1009_s21  ;;  %s40_s2 = scalar_lea.vmem %s1569_s1, %s1010_s22  ;;  %v258_v46 = vrot.slane %v1398_v14, %v257_v44 }
  0x17   :  { %1183 = vmatpush3.bf16.msra.mxu0 %v1182_v13  ;;  %1196 = vmatprep.subr.bf16.mxu1 %v1302_v3  ;;  %34 = vst.msk [vmem:[#allocation2] sm:$0x1] %vm33_vm1, %v32_v15  ;;  %v37_v16 = vld [vmem:[%s36_s10] sm:$0x1]  ;;  %s44_s15 = scalar_lea.vmem %s1569_s1, %s1011_s23  ;;  %s48_s18 = scalar_lea.vmem %s1569_s1, %s1012_s24 }
  0x18   :  { %1190 = vmatprep.subr.bf16.mxu0 %v1302_v3  ;;  %v41_v17 = vld [vmem:[%s40_s2] sm:$0x1]  ;;  %38 = vst.msk [vmem:[#allocation2 + $0x1] sm:$0x1] %vm33_vm1, %v37_v16  ;;  %s52_s20 = scalar_lea.vmem %s1569_s1, %s1388_s25  ;;  %s56_s27 = scalar_lea.vmem %s1569_s1, %s1390_s3 }
  0x19   :  { %1099 = vmatmul.mubr.msk.f32.vlgmr.msra.gmra.mrb[0].mxu1 %vm75_vm2, %v1398_v14  ;;  %42 = vst.msk [vmem:[#allocation2 + $0x2] sm:$0x1] %vm33_vm1, %v41_v17  ;;  %v45_v18 = vld [vmem:[%s44_s15] sm:$0x1]  ;;  %s60_s28 = scalar_lea.vmem %s1569_s1, %s1392_s26  ;;  %s1305_s3 = smov 64  }
  0x1a   :  { %v49_v19 = vld [vmem:[%s48_s18] sm:$0x1]  ;;  %1198 = vmatpush3.bf16.msra.mxu1 %v1361_v4  ;;  %1120 = vmatprep.mubr.msk.f32.mxu1 %vm1303_vm0, %v1304_v9  ;;  %46 = vst.msk [vmem:[#allocation2 + $0x3] sm:$0x1] %vm33_vm1, %v45_v18 }
  0x1b   :  { %50 = vst.msk [vmem:[#allocation2 + $0x4] sm:$0x1] %vm33_vm1, %v49_v19  ;;  %v53_v20 = vld [vmem:[%s52_s20] sm:$0x1]  ;;  %1199 = vmatprep.subr.bf16.mxu1 %v1302_v3 }
  0x1c   :  { %v57_v21 = vld [vmem:[%s56_s27] sm:$0x1]  ;;  %54 = vst.msk [vmem:[#allocation2 + $0x5] sm:$0x1] %vm33_vm1, %v53_v20 }
  0x1d   :  { %58 = vst.msk [vmem:[#allocation2 + $0x6] sm:$0x1] %vm33_vm1, %v57_v21  ;;  %v61_v22 = vld [vmem:[%s60_s28] sm:$0x1] }
  0x1e   :  { %62 = vst.msk [vmem:[#allocation2 + $0x7] sm:$0x1] %vm33_vm1, %v61_v22  ;;  %1201 = vmatpush3.bf16.msra.mxu1 %v1384_v12 }
  0x1f   :  { %1208 = vmatprep.subr.bf16.mxu1 %v1302_v3 }
  0x25   :  { %v63_v23 = vld [vmem:[#allocation2] sm:$0xff] }
  0x26   :  { %1088 = vmatmul.mubr.msk.f32.vlgmr.msra.gmra.mrb[0].mxu0 %vm75_vm2, %v63_v23 }
  0x27   :  { %1192 = vmatpush3.bf16.msra.mxu0 %v1361_v4  ;;  %1109 = vmatprep.mubr.msk.f32.mxu0 %vm1303_vm0, %v1304_v9 }
  0x28   :  { %1193 = vmatprep.subr.bf16.mxu0 %v1302_v3 }
  0x2b   :  { %1195 = vmatpush3.bf16.msra.mxu0 %v1384_v12 }
  0x2c   :  { %1202 = vmatprep.subr.bf16.mxu0 %v1302_v3 }
  0xec   :  { %v227_v25 = vpop.f32.mrb[0].mxu1 }
  0xed   :  { %v228_v26 = vadd.f32 %v227_v25, %v1455_v24  ;;  %v1100_v27 = vpop.f32.mrb[1].mxu1 }
  0xef   :  { %239 = vrot.lane.b32.xlu0 %v228_v26, %s1305_s3 }
  0xf9   :  { %v145_v29 = vpop.f32.mrb[0].mxu0 }
  0xfa   :  { %v146_v30 = vadd.f32 %v1016_v28, %v145_v29  ;;  %v1089_v31 = vpop.f32.mrb[1].mxu0 }
  0xfc   :  { %150 = vst.msk [vmem:[#allocation3] sm:$0xff] %vm149_vm3, %v146_v30 }
 0x103   :  { %v157_v32 = vld [vmem:[#allocation3] sm:$0x1]  ;;  %v269_v57 = vld [vmem:[#allocation3 + $0x1] sm:$0x1]  ;;  %v373_v17 = vld [vmem:[#allocation3 + $0x2] sm:$0x1] }
 0x104   :  { %v231_v33 = vadd.f32 %v228_v26, %v157_v32 }
 0x106   :  { %v1019_v34 = vmul.f32 -1.442695, %v231_v33 }
 0x108   :  { %1239 = vpow2.f32 %v1019_v34 }
 0x112   :  { %v1240_v35 = vpop.eup %1239 }
 0x113   :  { %v235_v36 = vadd.f32 1.0, %v1240_v35 }
 0x115   :  { %1241 = vrcp.f32 %v235_v36 }
 0x11f   :  { %v1242_v37 = vpop.eup %1241 }
 0x120   :  { %v249_v48 = vsub.f32 1.0, %v1242_v37 }
 0x161   :  { %v240_v38 = vpop.permute.xlu0 %239 }
 0x162   :  { %v242_v39 = vmul.f32 %v1242_v37, %v240_v38  ;;  %v477_v38 = vld [vmem:[#allocation3 + $0x3] sm:$0x1] }
 0x164   :  { %244 = vrot.lane.b32.xlu0 %v242_v39, %s1305_s3 }
 0x1d6   :  { %v245_v40 = vpop.permute.xlu0 %244 }
 0x1d7   :  { %v247_v41 = vadd.f32 %v245_v40, %v157_v32 }
 0x1d9   :  { %1243 = vtanh.f32 %v247_v41 }
 0x1e3   :  { %v1244_v45 = vpop.eup %1243 }
 0x1e4   :  { %251 = vrot.lane.b32.xlu1 %v1244_v45, %s1306_s5 }
 0x1e8   :  { %259 = vrot.lane.b32.xlu1 %v258_v46, %s1307_s6 }
 0x256   :  { %v252_v47 = vpop.permute.xlu1 %251 }
 0x257   :  { %v254_v50 = vmul.f32 %v252_v47, %v249_v48 }
 0x25a   :  { %v260_v49 = vpop.permute.xlu1 %259 }
 0x25b   :  { %v262_v51 = vmul.f32 %v1242_v37, %v260_v49 }
 0x25d   :  { %v263_v52 = vadd.f32 %v262_v51, %v254_v50 }
 0x25f   :  { %265 = vrot.lane.b32.xlu0 %v263_v52, %s1306_s5 }
 0x2d1   :  { %v266_v53 = vpop.permute.xlu0 %265 }
 0x2d2   :  { %268 = vst.msk [vmem:[%s1575_s7] sm:$0x1] %vm33_vm1, %v266_v53  ;;  %1110 = vmatmul.mubr.msk.f32.vlgmr.msra.gmra.mrb[2].mxu0 %vm75_vm2, %v266_v53 }
 0x2d3   :  { %1204 = vmatpush3.bf16.msra.mxu0 %v1361_v4  ;;  %1131 = vmatprep.mubr.msk.f32.mxu0 %vm1303_vm0, %v1304_v9 }
 0x2d4   :  { %1205 = vmatprep.subr.bf16.mxu0 %v1302_v3 }
 0x2d7   :  { %1207 = vmatpush3.bf16.msra.mxu0 %v1384_v12 }
 0x2d8   :  { %1214 = vmatprep.subr.bf16.mxu0 %v1302_v3 }
 0x3a5   :  { %v338_v54 = vpop.f32.mrb[2].mxu0 }
 0x3a6   :  { %v339_v55 = vadd.f32 %v338_v54, %v1455_v24  ;;  %v1111_v56 = vpop.f32.mrb[3].mxu0 }
 0x3a8   :  { %350 = vrot.lane.b32.xlu1 %v339_v55, %s1305_s3  ;;  %v342_v58 = vadd.f32 %v339_v55, %v269_v57 }
 0x3aa   :  { %v1021_v59 = vmul.f32 -1.442695, %v342_v58  ;;  %v581_v58 = vld [vmem:[#allocation3 + $0x4] sm:$0x1] }
 0x3ac   :  { %1245 = vpow2.f32 %v1021_v59 }
 0x3b6   :  { %v1246_v60 = vpop.eup %1245 }
 0x3b7   :  { %v346_v61 = vadd.f32 1.0, %v1246_v60 }
 0x3b9   :  { %1247 = vrcp.f32 %v346_v61 }
 0x3c3   :  { %v1248_v62 = vpop.eup %1247 }
 0x3c4   :  { %v360_v6 = vsub.f32 1.0, %v1248_v62  ;;  %v366_v8 = vmul.f32 %v1248_v62, %v263_v52 }
 0x41a   :  { %v351_v63 = vpop.permute.xlu1 %350 }
 0x41b   :  { %v353_v0 = vmul.f32 %v1248_v62, %v351_v63 }
 0x41d   :  { %355 = vrot.lane.b32.xlu0 %v353_v0, %s1305_s3 }
 0x48f   :  { %v356_v1 = vpop.permute.xlu0 %355 }
 0x490   :  { %v358_v2 = vadd.f32 %v356_v1, %v269_v57 }
 0x492   :  { %1249 = vtanh.f32 %v358_v2 }
 0x49c   :  { %v1250_v5 = vpop.eup %1249 }
 0x49d   :  { %362 = vrot.lane.b32.xlu1 %v1250_v5, %s1306_s5 }
 0x50f   :  { %v363_v7 = vpop.permute.xlu1 %362 }
 0x510   :  { %v365_v10 = vmul.f32 %v363_v7, %v360_v6 }
 0x512   :  { %v367_v11 = vadd.f32 %v366_v8, %v365_v10 }
 0x514   :  { %369 = vrot.lane.b32.xlu0 %v367_v11, %s1306_s5 }
 0x586   :  { %v370_v13 = vpop.permute.xlu0 %369 }
 0x587   :  { %372 = vst.msk [vmem:[%s1575_s7 + $0x1] sm:$0x1] %vm33_vm1, %v370_v13  ;;  %1121 = vmatmul.mubr.msk.f32.vlgmr.msra.gmra.mrb[2].mxu1 %vm75_vm2, %v370_v13 }
 0x588   :  { %1210 = vmatpush3.bf16.msra.mxu1 %v1361_v4  ;;  %1142 = vmatprep.mubr.msk.f32.mxu1 %vm1303_vm0, %v1304_v9 }
 0x589   :  { %1211 = vmatprep.subr.bf16.mxu1 %v1302_v3 }
 0x58c   :  { %1213 = vmatpush3.bf16.msra.mxu1 %v1384_v12 }
 0x58d   :  { %1220 = vmatprep.subr.bf16.mxu1 %v1302_v3 }
 0x65a   :  { %v442_v14 = vpop.f32.mrb[2].mxu1 }
 0x65b   :  { %v443_v15 = vadd.f32 %v442_v14, %v1455_v24  ;;  %v1122_v16 = vpop.f32.mrb[3].mxu1 }
 0x65d   :  { %454 = vrot.lane.b32.xlu1 %v443_v15, %s1305_s3  ;;  %v446_v18 = vadd.f32 %v443_v15, %v373_v17 }
 0x65f   :  { %v1023_v19 = vmul.f32 -1.442695, %v446_v18  ;;  %v685_v18 = vld [vmem:[#allocation3 + $0x5] sm:$0x1] }
 0x661   :  { %1251 = vpow2.f32 %v1023_v19 }
 0x66b   :  { %v1252_v20 = vpop.eup %1251 }
 0x66c   :  { %v450_v21 = vadd.f32 1.0, %v1252_v20 }
 0x66e   :  { %1253 = vrcp.f32 %v450_v21 }
 0x678   :  { %v1254_v22 = vpop.eup %1253 }
 0x679   :  { %v464_v29 = vsub.f32 1.0, %v1254_v22  ;;  %v470_v31 = vmul.f32 %v1254_v22, %v367_v11 }
 0x6cf   :  { %v455_v23 = vpop.permute.xlu1 %454 }
 0x6d0   :  { %v457_v25 = vmul.f32 %v1254_v22, %v455_v23 }
 0x6d2   :  { %459 = vrot.lane.b32.xlu0 %v457_v25, %s1305_s3 }
 0x744   :  { %v460_v26 = vpop.permute.xlu0 %459 }
 0x745   :  { %v462_v27 = vadd.f32 %v460_v26, %v373_v17 }
 0x747   :  { %1255 = vtanh.f32 %v462_v27 }
 0x751   :  { %v1256_v28 = vpop.eup %1255 }
 0x752   :  { %466 = vrot.lane.b32.xlu1 %v1256_v28, %s1306_s5 }
 0x7c4   :  { %v467_v30 = vpop.permute.xlu1 %466 }
 0x7c5   :  { %v469_v32 = vmul.f32 %v467_v30, %v464_v29 }
 0x7c7   :  { %v471_v33 = vadd.f32 %v470_v31, %v469_v32 }
 0x7c9   :  { %473 = vrot.lane.b32.xlu0 %v471_v33, %s1306_s5 }
 0x83b   :  { %v474_v34 = vpop.permute.xlu0 %473 }
 0x83c   :  { %476 = vst.msk [vmem:[%s1575_s7 + $0x2] sm:$0x1] %vm33_vm1, %v474_v34  ;;  %1132 = vmatmul.mubr.msk.f32.vlgmr.msra.gmra.mrb[4].mxu0 %vm75_vm2, %v474_v34 }
 0x83d   :  { %1216 = vmatpush3.bf16.msra.mxu0 %v1361_v4  ;;  %1153 = vmatprep.mubr.msk.f32.mxu0 %vm1303_vm0, %v1304_v9 }
 0x83e   :  { %1217 = vmatprep.subr.bf16.mxu0 %v1302_v3 }
 0x841   :  { %1219 = vmatpush3.bf16.msra.mxu0 %v1384_v12 }
 0x842   :  { %1226 = vmatprep.subr.bf16.mxu0 %v1302_v3 }
 0x90f   :  { %v546_v35 = vpop.f32.mrb[4].mxu0 }
 0x910   :  { %v547_v36 = vadd.f32 %v546_v35, %v1455_v24  ;;  %v1133_v37 = vpop.f32.mrb[5].mxu0  ;;  %v789_v35 = vld [vmem:[#allocation3 + $0x6] sm:$0x1] }
 0x912   :  { %558 = vrot.lane.b32.xlu1 %v547_v36, %s1305_s3  ;;  %v550_v39 = vadd.f32 %v547_v36, %v477_v38 }
 0x914   :  { %v1025_v40 = vmul.f32 -1.442695, %v550_v39 }
 0x916   :  { %1257 = vpow2.f32 %v1025_v40 }
 0x920   :  { %v1258_v41 = vpop.eup %1257 }
 0x921   :  { %v554_v42 = vadd.f32 1.0, %v1258_v41 }
 0x923   :  { %1259 = vrcp.f32 %v554_v42 }
 0x92d   :  { %v1260_v43 = vpop.eup %1259 }
 0x92e   :  { %v568_v49 = vsub.f32 1.0, %v1260_v43  ;;  %v574_v51 = vmul.f32 %v1260_v43, %v471_v33 }
 0x984   :  { %v559_v44 = vpop.permute.xlu1 %558 }
 0x985   :  { %v561_v45 = vmul.f32 %v1260_v43, %v559_v44 }
 0x987   :  { %563 = vrot.lane.b32.xlu0 %v561_v45, %s1305_s3 }
 0x9f9   :  { %v564_v46 = vpop.permute.xlu0 %563 }
 0x9fa   :  { %v566_v47 = vadd.f32 %v564_v46, %v477_v38 }
 0x9fc   :  { %1261 = vtanh.f32 %v566_v47 }
 0xa06   :  { %v1262_v48 = vpop.eup %1261 }
 0xa07   :  { %570 = vrot.lane.b32.xlu1 %v1262_v48, %s1306_s5 }
 0xa79   :  { %v571_v50 = vpop.permute.xlu1 %570 }
 0xa7a   :  { %v573_v52 = vmul.f32 %v571_v50, %v568_v49 }
 0xa7c   :  { %v575_v53 = vadd.f32 %v574_v51, %v573_v52 }
 0xa7e   :  { %577 = vrot.lane.b32.xlu0 %v575_v53, %s1306_s5 }
 0xaf0   :  { %v578_v54 = vpop.permute.xlu0 %577 }
 0xaf1   :  { %580 = vst.msk [vmem:[%s1575_s7 + $0x3] sm:$0x1] %vm33_vm1, %v578_v54  ;;  %1143 = vmatmul.mubr.msk.f32.vlgmr.msra.gmra.mrb[4].mxu1 %vm75_vm2, %v578_v54 }
 0xaf2   :  { %1222 = vmatpush3.bf16.msra.mxu1 %v1361_v4  ;;  %1164 = vmatprep.mubr.msk.f32.mxu1 %vm1303_vm0, %v1304_v9 }
 0xaf3   :  { %1223 = vmatprep.subr.bf16.mxu1 %v1302_v3 }
 0xaf6   :  { %1225 = vmatpush3.bf16.msra.mxu1 %v1384_v12 }
 0xbc4   :  { %v650_v55 = vpop.f32.mrb[4].mxu1 }
 0xbc5   :  { %v651_v56 = vadd.f32 %v650_v55, %v1455_v24  ;;  %v1144_v57 = vpop.f32.mrb[5].mxu1  ;;  %v893_v55 = vld [vmem:[#allocation3 + $0x7] sm:$0x1] }
 0xbc7   :  { %662 = vrot.lane.b32.xlu1 %v651_v56, %s1305_s3  ;;  %v654_v59 = vadd.f32 %v651_v56, %v581_v58 }
 0xbc9   :  { %v1027_v60 = vmul.f32 -1.442695, %v654_v59 }
 0xbcb   :  { %1263 = vpow2.f32 %v1027_v60 }
 0xbd5   :  { %v1264_v61 = vpop.eup %1263 }
 0xbd6   :  { %v658_v62 = vadd.f32 1.0, %v1264_v61 }
 0xbd8   :  { %1265 = vrcp.f32 %v658_v62 }
 0xbe2   :  { %v1266_v63 = vpop.eup %1265 }
 0xbe3   :  { %v672_v7 = vsub.f32 1.0, %v1266_v63  ;;  %v678_v10 = vmul.f32 %v1266_v63, %v575_v53 }
 0xc39   :  { %v663_v0 = vpop.permute.xlu1 %662 }
 0xc3a   :  { %v665_v1 = vmul.f32 %v1266_v63, %v663_v0 }
 0xc3c   :  { %667 = vrot.lane.b32.xlu0 %v665_v1, %s1305_s3 }
 0xcae   :  { %v668_v2 = vpop.permute.xlu0 %667 }
 0xcaf   :  { %v670_v5 = vadd.f32 %v668_v2, %v581_v58 }
 0xcb1   :  { %1267 = vtanh.f32 %v670_v5 }
 0xcbb   :  { %v1268_v6 = vpop.eup %1267 }
 0xcbc   :  { %674 = vrot.lane.b32.xlu1 %v1268_v6, %s1306_s5 }
 0xd2e   :  { %v675_v8 = vpop.permute.xlu1 %674 }
 0xd2f   :  { %v677_v11 = vmul.f32 %v675_v8, %v672_v7 }
 0xd31   :  { %v679_v13 = vadd.f32 %v678_v10, %v677_v11 }
 0xd33   :  { %681 = vrot.lane.b32.xlu0 %v679_v13, %s1306_s5 }
 0xda5   :  { %v682_v14 = vpop.permute.xlu0 %681 }
 0xda6   :  { %684 = vst.msk [vmem:[%s1575_s7 + $0x4] sm:$0x1] %vm33_vm1, %v682_v14  ;;  %1154 = vmatmul.mubr.msk.f32.vlgmr.msra.gmra.mrb[6].mxu0 %vm75_vm2, %v682_v14 }
 0xda7   :  { %1228 = vmatpush3.bf16.msra.mxu0 %v1361_v4  ;;  %1175 = vmatprep.mubr.msk.f32.mxu0 %vm1303_vm0, %v1304_v9 }
 0xda8   :  { %1229 = vmatprep.subr.bf16.mxu0 %v1302_v3 }
 0xdab   :  { %1231 = vmatpush3.bf16.msra.mxu0 %v1384_v12 }
 0xe79   :  { %v754_v15 = vpop.f32.mrb[6].mxu0 }
 0xe7a   :  { %v755_v16 = vadd.f32 %v754_v15, %v1455_v24  ;;  %v1155_v17 = vpop.f32.mrb[7].mxu0 }
 0xe7c   :  { %766 = vrot.lane.b32.xlu1 %v755_v16, %s1305_s3  ;;  %v758_v19 = vadd.f32 %v755_v16, %v685_v18 }
 0xe7e   :  { %v1029_v20 = vmul.f32 -1.442695, %v758_v19 }
 0xe80   :  { %1269 = vpow2.f32 %v1029_v20 }
 0xe8a   :  { %v1270_v21 = vpop.eup %1269 }
 0xe8b   :  { %v762_v22 = vadd.f32 1.0, %v1270_v21 }
 0xe8d   :  { %1271 = vrcp.f32 %v762_v22 }
 0xe97   :  { %v1272_v4 = vpop.eup %1271 }
 0xe98   :  { %v776_v26 = vsub.f32 1.0, %v1272_v4  ;;  %v782_v28 = vmul.f32 %v1272_v4, %v679_v13 }
 0xeee   :  { %v767_v23 = vpop.permute.xlu1 %766 }
 0xeef   :  { %v769_v9 = vmul.f32 %v1272_v4, %v767_v23 }
 0xef1   :  { %771 = vrot.lane.b32.xlu0 %v769_v9, %s1305_s3 }
 0xf63   :  { %v772_v3 = vpop.permute.xlu0 %771 }
 0xf64   :  { %v774_v12 = vadd.f32 %v772_v3, %v685_v18 }
 0xf66   :  { %1273 = vtanh.f32 %v774_v12 }
 0xf70   :  { %v1274_v25 = vpop.eup %1273 }
 0xf71   :  { %778 = vrot.lane.b32.xlu1 %v1274_v25, %s1306_s5 }
 0xfe3   :  { %v779_v27 = vpop.permute.xlu1 %778 }
 0xfe4   :  { %v781_v29 = vmul.f32 %v779_v27, %v776_v26 }
 0xfe6   :  { %v783_v30 = vadd.f32 %v782_v28, %v781_v29 }
 0xfe8   :  { %785 = vrot.lane.b32.xlu0 %v783_v30, %s1306_s5 }
0x105a   :  { %v786_v31 = vpop.permute.xlu0 %785 }
0x105b   :  { %788 = vst.msk [vmem:[%s1575_s7 + $0x5] sm:$0x1] %vm33_vm1, %v786_v31  ;;  %1165 = vmatmul.mubr.msk.f32.vlgmr.msra.gmra.mrb[6].mxu1 %vm75_vm2, %v786_v31 }
0x112e   :  { %v858_v32 = vpop.f32.mrb[6].mxu1 }
0x112f   :  { %v859_v33 = vadd.f32 %v858_v32, %v1455_v24  ;;  %v1166_v34 = vpop.f32.mrb[7].mxu1 }
0x1131   :  { %870 = vrot.lane.b32.xlu1 %v859_v33, %s1305_s3  ;;  %v862_v36 = vadd.f32 %v859_v33, %v789_v35 }
0x1133   :  { %v1031_v37 = vmul.f32 -1.442695, %v862_v36 }
0x1135   :  { %1275 = vpow2.f32 %v1031_v37 }
0x113f   :  { %v1276_v38 = vpop.eup %1275 }
0x1140   :  { %v866_v39 = vadd.f32 1.0, %v1276_v38 }
0x1142   :  { %1277 = vrcp.f32 %v866_v39 }
0x114c   :  { %v1278_v40 = vpop.eup %1277 }
0x114d   :  { %v880_v46 = vsub.f32 1.0, %v1278_v40  ;;  %v886_v48 = vmul.f32 %v1278_v40, %v783_v30 }
0x11a3   :  { %v871_v41 = vpop.permute.xlu1 %870 }
0x11a4   :  { %v873_v42 = vmul.f32 %v1278_v40, %v871_v41 }
0x11a6   :  { %875 = vrot.lane.b32.xlu0 %v873_v42, %s1305_s3 }
0x1218   :  { %v876_v43 = vpop.permute.xlu0 %875 }
0x1219   :  { %v878_v44 = vadd.f32 %v876_v43, %v789_v35 }
0x121b   :  { %1279 = vtanh.f32 %v878_v44 }
0x1225   :  { %v1280_v45 = vpop.eup %1279 }
0x1226   :  { %882 = vrot.lane.b32.xlu1 %v1280_v45, %s1306_s5 }
0x1298   :  { %v883_v47 = vpop.permute.xlu1 %882 }
0x1299   :  { %v885_v49 = vmul.f32 %v883_v47, %v880_v46 }
0x129b   :  { %v887_v50 = vadd.f32 %v886_v48, %v885_v49 }
0x129d   :  { %889 = vrot.lane.b32.xlu0 %v887_v50, %s1306_s5 }
0x130f   :  { %v890_v51 = vpop.permute.xlu0 %889 }
0x1310   :  { %892 = vst.msk [vmem:[%s1575_s7 + $0x6] sm:$0x1] %vm33_vm1, %v890_v51  ;;  %1176 = vmatmul.mubr.msk.f32.vlgmr.msra.gmra.mrb[8].mxu0 %vm75_vm2, %v890_v51 }
0x13e3   :  { %v962_v52 = vpop.f32.mrb[8].mxu0 }
0x13e4   :  { %v963_v53 = vadd.f32 %v962_v52, %v1455_v24  ;;  %v1177_v54 = vpop.f32.mrb[9].mxu0 }
0x13e6   :  { %974 = vrot.lane.b32.xlu1 %v963_v53, %s1305_s3  ;;  %v966_v56 = vadd.f32 %v963_v53, %v893_v55 }
0x13e8   :  { %v1033_v57 = vmul.f32 -1.442695, %v966_v56 }
0x13ea   :  { %1281 = vpow2.f32 %v1033_v57 }
0x13f4   :  { %v1282_v58 = vpop.eup %1281 }
0x13f5   :  { %v970_v59 = vadd.f32 1.0, %v1282_v58 }
0x13f7   :  { %1283 = vrcp.f32 %v970_v59 }
0x1401   :  { %v1284_v60 = vpop.eup %1283 }
0x1402   :  { %v984_v24 = vsub.f32 1.0, %v1284_v60  ;;  %v990_v5 = vmul.f32 %v1284_v60, %v887_v50 }
0x1458   :  { %v975_v61 = vpop.permute.xlu1 %974 }
0x1459   :  { %v977_v62 = vmul.f32 %v1284_v60, %v975_v61 }
0x145b   :  { %979 = vrot.lane.b32.xlu0 %v977_v62, %s1305_s3 }
0x14cd   :  { %v980_v63 = vpop.permute.xlu0 %979 }
0x14ce   :  { %v982_v0 = vadd.f32 %v980_v63, %v893_v55 }
0x14d0   :  { %1285 = vtanh.f32 %v982_v0 }
0x14da   :  { %v1286_v1 = vpop.eup %1285 }
0x14db   :  { %986 = vrot.lane.b32.xlu1 %v1286_v1, %s1306_s5 }
0x154d   :  { %v987_v2 = vpop.permute.xlu1 %986 }
0x154e   :  { %v989_v6 = vmul.f32 %v987_v2, %v984_v24 }
0x1550   :  { %v991_v7 = vadd.f32 %v990_v5, %v989_v6 }
0x1552   :  { %993 = vrot.lane.b32.xlu0 %v991_v7, %s1306_s5 }
0x15c4   :  { %v994_v8 = vpop.permute.xlu0 %993 }
0x15c5   :  { %996 = vst.msk [vmem:[%s1575_s7 + $0x7] sm:$0x1] %vm33_vm1, %v994_v8 }

</bundles_post_ra>
